<compile_context>
chip_gen: v5e
topology: v5e:2x2
jax: 0.10.0
libtpu: 0.0.40
codegen_flags: <defaults>
</compile_context>

<pallas_src>
import functools

import jax
import jax.numpy as jnp
from jax.experimental import pallas as pl
from jax.experimental.pallas import tpu as pltpu


def _tv_l1_kernel(x_ref, out_ref, h_acc, w_acc, prev_row,
                  *, H, W, tile_h, h_scale, w_scale, has_partial_tail):
    i = pl.program_id(0)
    nsteps = pl.num_programs(0)

    @pl.when(i == 0)
    def _init():
        h_acc[...] = jnp.zeros_like(h_acc)
        w_acc[...] = jnp.zeros_like(w_acc)

    x = x_ref[...]                                    # (tile_h, W), input dtype

    # Shifted views via XLU rotations (shift by size-1 == shift by -1).
    x_dn = pltpu.roll(x, shift=tile_h - 1, axis=0)    # x_dn[r, :] == x[(r+1)%tile_h, :]
    x_rt = pltpu.roll(x, shift=W - 1, axis=1)         # x_rt[:, c] == x[:, (c+1)%W]

    # Diffs in the input dtype (bf16 native on v6e/v7x VPU); accumulate in f32.
    adh = jnp.abs(x_dn - x).astype(jnp.float32)
    adw = jnp.abs(x_rt - x).astype(jnp.float32)

    if has_partial_tail:
        # Last panel may contain padding rows.  Row validity comes from one
        # scalar (scalar-unit math); per element: 1 compare + 1 select per path.
        valid_rows = jnp.minimum(tile_h, H - i * tile_h)
        lrow = jax.lax.broadcasted_iota(jnp.int32, (tile_h, W), 0)
        h_sum = jnp.sum(jnp.where(lrow < valid_rows - 1, adh, 0.0),
                        axis=0, keepdims=True)
        w_sum = jnp.sum(jnp.where(lrow < valid_rows, adw, 0.0),
                        axis=0, keepdims=True)
    else:
        # Every panel is full: no per-element masks.  The wrapped row of the
        # vertical diff is removed with a single (1, W) subtraction.
        h_sum = jnp.sum(adh, axis=0, keepdims=True) - adh[tile_h - 1:tile_h, :]
        w_sum = jnp.sum(adw, axis=0, keepdims=True)

    # Stage 1: per-column partials stay resident in VMEM.
    h_acc[...] += h_sum
    w_acc[...] += w_sum

    # Vertical seam between this panel and the previous one.
    @pl.when(i > 0)
    def _seam():
        h_acc[...] += jnp.abs(x[0:1, :] - prev_row[...]).astype(jnp.float32)

    # Carry the last row for the next panel's seam.  (Only the final panel can
    # be partial, and its carry is never consumed.)
    prev_row[...] = x[tile_h - 1:tile_h, :]

    # Stage 2: single cross-lane reduce + scaling, once per kernel.  The
    # wrapped column (lane W-1) of w_acc is dropped here instead of per tile.
    @pl.when(i == nsteps - 1)
    def _finalize():
        lane = jax.lax.broadcasted_iota(jnp.int32, (1, W), 1)
        w_tot = jnp.sum(jnp.where(lane < W - 1, w_acc[...], 0.0))
        h_tot = jnp.sum(h_acc[...])
        out_ref[0] = h_scale * h_tot + w_scale * w_tot


def _choose_tile_h(H, W, itemsize, target_bytes=2 * 1024 * 1024):
    """Row-panel height: multiple of 8, ~target_bytes per block, capped at 1024.

    Prefers a height that divides H exactly (keeps every panel full so the
    kernel can skip per-element row masks) as long as it stays within ~2x of
    the VMEM-budget tile.
    """
    bytes_per_row = max(1, W * itemsize)
    t = int((target_bytes // bytes_per_row) // 8 * 8)
    t = max(8, min(t, 1024))
    if t >= H:
        return H                        # single full-extent block is always legal
    for cand in range(t, max(8, t // 2) - 1, -8):
        if H % cand == 0:
            return cand
    return t


def l_tv_l1(x, tv_loss_weight=1.0, *, tile_h=None):
    """Pallas TPU implementation of L_TV_L1.forward for a 2-D input (H, W)."""
    H, W = x.shape
    count_h = (H - 1) * W
    count_w = H * (W - 1)
    weight = float(tv_loss_weight)
    # Mirror the PyTorch module: a zero count gives NaN (0/0), not an error.
    h_scale = (2.0 * weight / count_h) if count_h > 0 else float("nan")
    w_scale = (2.0 * weight / count_w) if count_w > 0 else float("nan")

    if tile_h is None:
        tile_h = _choose_tile_h(H, W, x.dtype.itemsize)
    tile_h = int(tile_h)
    num_tiles = pl.cdiv(H, tile_h)
    has_partial_tail = (H % tile_h) != 0

    kernel = functools.partial(
        _tv_l1_kernel,
        H=H, W=W, tile_h=tile_h, h_scale=h_scale, w_scale=w_scale,
        has_partial_tail=has_partial_tail,
    )

    out = pl.pallas_call(
        kernel,
        out_shape=jax.ShapeDtypeStruct((1,), jnp.float32),
        grid=(num_tiles,),
        in_specs=[pl.BlockSpec((tile_h, W), lambda i: (i, 0))],
        out_specs=pl.BlockSpec(memory_space=pltpu.SMEM),
        scratch_shapes=[
            pltpu.VMEM((1, W), jnp.float32),   # h_acc: per-column vertical partials
            pltpu.VMEM((1, W), jnp.float32),   # w_acc: per-column horizontal partials
            pltpu.VMEM((1, W), x.dtype),       # prev_row: seam carry
        ],
        compiler_params=pltpu.CompilerParams(
            dimension_semantics=("arbitrary",),        # sequential: prev-row carry
            vmem_limit_bytes=32 * 1024 * 1024,
        ),
    )(x)
    return out[0]


def l_tv_l1_ref(x, tv_loss_weight=1.0):
    """Pure-JAX reference mirroring the PyTorch forward exactly."""
    H, W = x.shape
    count_h = (H - 1) * W
    count_w = H * (W - 1)
    h_tv = jnp.sum(jnp.abs(x[1:, :] - x[: H - 1, :]))
    w_tv = jnp.sum(jnp.abs(x[:, 1:] - x[:, : W - 1]))
    return tv_loss_weight * 2.0 * (h_tv / count_h + w_tv / count_w)


if __name__ == "__main__":
    key = jax.random.PRNGKey(0)
    k1, k2, k3 = jax.random.split(key, 3)

    # Case 1: single full-extent panel (lean path, no seams).
    x1 = jax.random.normal(k1, (64, 256), dtype=jnp.float32)
    out1 = jax.block_until_ready(l_tv_l1(x1, tv_loss_weight=1.0))
    ref1 = l_tv_l1_ref(x1, tv_loss_weight=1.0)
    assert jnp.allclose(out1, ref1, rtol=1e-5, atol=1e-5), (out1, ref1)

    # Case 2: multiple full panels (lean path) — exercises the prev-row seam
    # carry and the finalize-time wrapped-column drop.
    x2 = jax.random.normal(k2, (64, 256), dtype=jnp.float32)
    out2 = jax.block_until_ready(l_tv_l1(x2, tv_loss_weight=1.0, tile_h=16))
    ref2 = l_tv_l1_ref(x2, tv_loss_weight=1.0)
    assert jnp.allclose(out2, ref2, rtol=1e-5, atol=1e-5), (out2, ref2)

    # Case 3: partial last panel (masked path) with a non-unit weight —
    # exercises the scalar valid-row masks and the seam carry together.
    x3 = jax.random.normal(k3, (56, 128), dtype=jnp.float32)
    out3 = jax.block_until_ready(l_tv_l1(x3, tv_loss_weight=0.5, tile_h=16))
    ref3 = l_tv_l1_ref(x3, tv_loss_weight=0.5)
    assert jnp.allclose(out3, ref3, rtol=1e-5, atol=1e-5), (out3, ref3)

    print("KERNEL_OK")
</pallas_src>

<mosaic_0001>
module attributes {stable_mosaic.version = 11 : i64} {
  func.func @_tv_l1_kernel(%arg0: i32, %arg1: memref<64x256xf32, #tpu.memory_space<vmem>>, %arg2: memref<1xf32, #tpu.memory_space<smem>>, %arg3: memref<1x256xf32, #tpu.memory_space<vmem>>, %arg4: memref<1x256xf32, #tpu.memory_space<vmem>>, %arg5: memref<1x256xf32, #tpu.memory_space<vmem>>) attributes {dimension_semantics = [#tpu.dimension_semantics<arbitrary>], iteration_bounds = array<i64: 1>, scalar_prefetch = 0 : i64, scratch_operands = 3 : i64, tpu.core_type = #tpu.core_type<tc>, window_params = [{transform_indices = @transform_0, window_bounds = array<i64: 64, 256>}, {transform_indices = @transform_1, window_bounds = array<i64: 1>}]} {
    %c0_i32 = arith.constant 0 : i32
    %0 = arith.cmpi eq, %arg0, %c0_i32 : i32
    %1 = arith.extui %0 : i1 to i32
    %c0_i32_0 = arith.constant 0 : i32
    %2 = arith.cmpi ne, %1, %c0_i32_0 : i32
    scf.if %2 {
      %cst_17 = arith.constant 0.000000e+00 : f32
      %30 = vector.broadcast %cst_17 : f32 to vector<1x256xf32>
      %c0_18 = arith.constant 0 : index
      %c0_19 = arith.constant 0 : index
      %31 = vector.load %arg3[%c0_18, %c0_19] : memref<1x256xf32, #tpu.memory_space<vmem>>, vector<1x256xf32>
      tpu.vector_store %arg3[%c0_18, %c0_19], %30 {strides = array<i32>} : memref<1x256xf32, #tpu.memory_space<vmem>>, vector<1x256xf32>,
      %cst_20 = arith.constant 0.000000e+00 : f32
      %32 = vector.broadcast %cst_20 : f32 to vector<1x256xf32>
      %c0_21 = arith.constant 0 : index
      %c0_22 = arith.constant 0 : index
      %33 = vector.load %arg4[%c0_21, %c0_22] : memref<1x256xf32, #tpu.memory_space<vmem>>, vector<1x256xf32>
      tpu.vector_store %arg4[%c0_21, %c0_22], %32 {strides = array<i32>} : memref<1x256xf32, #tpu.memory_space<vmem>>, vector<1x256xf32>,
    } else {
    }
    %c0 = arith.constant 0 : index
    %c0_1 = arith.constant 0 : index
    %3 = vector.load %arg1[%c0, %c0_1] : memref<64x256xf32, #tpu.memory_space<vmem>>, vector<64x256xf32>
    %c63_i32 = arith.constant 63 : i32
    %4 = tpu.dynamic_rotate %3 by %c63_i32 dim 0 : vector<64x256xf32>, i32 -> vector<64x256xf32>
    %c255_i32 = arith.constant 255 : i32
    %5 = tpu.dynamic_rotate %3 by %c255_i32 dim 1 : vector<64x256xf32>, i32 -> vector<64x256xf32>
    %6 = arith.subf %4, %3 : vector<64x256xf32>
    %7 = math.absf %6 : vector<64x256xf32>
    %8 = arith.subf %5, %3 : vector<64x256xf32>
    %9 = math.absf %8 : vector<64x256xf32>
    %cst = arith.constant dense<0.000000e+00> : vector<256xf32>
    %10 = vector.multi_reduction <add>, %7, %cst [0] : vector<64x256xf32> to vector<256xf32>
    %11 = vector.shape_cast %10 : vector<256xf32> to vector<1x256xf32>
    %12 = vector.extract_strided_slice %7 {offsets = [63, 0], sizes = [1, 256], strides = [1, 1]} : vector<64x256xf32> to vector<1x256xf32>
    %13 = arith.subf %11, %12 : vector<1x256xf32>
    %cst_2 = arith.constant dense<0.000000e+00> : vector<256xf32>
    %14 = vector.multi_reduction <add>, %9, %cst_2 [0] : vector<64x256xf32> to vector<256xf32>
    %15 = vector.shape_cast %14 : vector<256xf32> to vector<1x256xf32>
    %c0_3 = arith.constant 0 : index
    %c0_4 = arith.constant 0 : index
    %16 = vector.load %arg3[%c0_3, %c0_4] : memref<1x256xf32, #tpu.memory_space<vmem>>, vector<1x256xf32>
    %17 = arith.addf %16, %13 : vector<1x256xf32>
    %c0_5 = arith.constant 0 : index
    %c0_6 = arith.constant 0 : index
    %18 = vector.load %arg3[%c0_5, %c0_6] : memref<1x256xf32, #tpu.memory_space<vmem>>, vector<1x256xf32>
    tpu.vector_store %arg3[%c0_5, %c0_6], %17 {strides = array<i32>} : memref<1x256xf32, #tpu.memory_space<vmem>>, vector<1x256xf32>,
    %c0_7 = arith.constant 0 : index
    %c0_8 = arith.constant 0 : index
    %19 = vector.load %arg4[%c0_7, %c0_8] : memref<1x256xf32, #tpu.memory_space<vmem>>, vector<1x256xf32>
    %20 = arith.addf %19, %15 : vector<1x256xf32>
    %c0_9 = arith.constant 0 : index
    %c0_10 = arith.constant 0 : index
    %21 = vector.load %arg4[%c0_9, %c0_10] : memref<1x256xf32, #tpu.memory_space<vmem>>, vector<1x256xf32>
    tpu.vector_store %arg4[%c0_9, %c0_10], %20 {strides = array<i32>} : memref<1x256xf32, #tpu.memory_space<vmem>>, vector<1x256xf32>,
    %c0_i32_11 = arith.constant 0 : i32
    %22 = arith.cmpi sgt, %arg0, %c0_i32_11 : i32
    %23 = arith.extui %22 : i1 to i32
    %c0_i32_12 = arith.constant 0 : i32
    %24 = arith.cmpi ne, %23, %c0_i32_12 : i32
    scf.if %24 {
      %c0_17 = arith.constant 0 : index
      %c0_18 = arith.constant 0 : index
      %30 = vector.load %arg3[%c0_17, %c0_18] : memref<1x256xf32, #tpu.memory_space<vmem>>, vector<1x256xf32>
      %31 = vector.extract_strided_slice %3 {offsets = [0, 0], sizes = [1, 256], strides = [1, 1]} : vector<64x256xf32> to vector<1x256xf32>
      %c0_19 = arith.constant 0 : index
      %c0_20 = arith.constant 0 : index
      %32 = vector.load %arg5[%c0_19, %c0_20] : memref<1x256xf32, #tpu.memory_space<vmem>>, vector<1x256xf32>
      %33 = arith.subf %31, %32 : vector<1x256xf32>
      %34 = math.absf %33 : vector<1x256xf32>
      %35 = arith.addf %30, %34 : vector<1x256xf32>
      %c0_21 = arith.constant 0 : index
      %c0_22 = arith.constant 0 : index
      %36 = vector.load %arg3[%c0_21, %c0_22] : memref<1x256xf32, #tpu.memory_space<vmem>>, vector<1x256xf32>
      tpu.vector_store %arg3[%c0_21, %c0_22], %35 {strides = array<i32>} : memref<1x256xf32, #tpu.memory_space<vmem>>, vector<1x256xf32>,
    } else {
    }
    %25 = vector.extract_strided_slice %3 {offsets = [63, 0], sizes = [1, 256], strides = [1, 1]} : vector<64x256xf32> to vector<1x256xf32>
    %c0_13 = arith.constant 0 : index
    %c0_14 = arith.constant 0 : index
    %26 = vector.load %arg5[%c0_13, %c0_14] : memref<1x256xf32, #tpu.memory_space<vmem>>, vector<1x256xf32>
    tpu.vector_store %arg5[%c0_13, %c0_14], %25 {strides = array<i32>} : memref<1x256xf32, #tpu.memory_space<vmem>>, vector<1x256xf32>,
    %c0_i32_15 = arith.constant 0 : i32
    %27 = arith.cmpi eq, %arg0, %c0_i32_15 : i32
    %28 = arith.extui %27 : i1 to i32
    %c0_i32_16 = arith.constant 0 : i32
    %29 = arith.cmpi ne, %28, %c0_i32_16 : i32
    scf.if %29 {
      %30 = tpu.iota {dimensions = array<i32: 1>} : vector<1x256xi32>
      %c255_i32_17 = arith.constant 255 : i32
      %31 = vector.broadcast %c255_i32_17 : i32 to vector<1x256xi32>
      %32 = arith.cmpi slt, %30, %31 : vector<1x256xi32>
      %c0_18 = arith.constant 0 : index
      %c0_19 = arith.constant 0 : index
      %33 = vector.load %arg4[%c0_18, %c0_19] : memref<1x256xf32, #tpu.memory_space<vmem>>, vector<1x256xf32>
      %cst_20 = arith.constant 0.000000e+00 : f32
      %34 = vector.broadcast %cst_20 : f32 to vector<1x256xf32>
      %35 = arith.select %32, %33, %34 : vector<1x256xi1>, vector<1x256xf32>
      %36 = vector.shape_cast %35 : vector<1x256xf32> to vector<1x1x256xf32>
      %cst_21 = arith.constant dense<0.000000e+00> : vector<1xf32>
      %37 = vector.multi_reduction <add>, %36, %cst_21 [1, 2] : vector<1x1x256xf32> to vector<1xf32>
      %38 = vector.shape_cast %37 : vector<1xf32> to vector<1x1x1xf32>
      %39 = vector.extract %38[0, 0, 0] : f32 from vector<1x1x1xf32>
      %c0_22 = arith.constant 0 : index
      %c0_23 = arith.constant 0 : index
      %40 = vector.load %arg3[%c0_22, %c0_23] : memref<1x256xf32, #tpu.memory_space<vmem>>, vector<1x256xf32>
      %41 = vector.shape_cast %40 : vector<1x256xf32> to vector<1x1x256xf32>
      %cst_24 = arith.constant dense<0.000000e+00> : vector<1xf32>
      %42 = vector.multi_reduction <add>, %41, %cst_24 [1, 2] : vector<1x1x256xf32> to vector<1xf32>
      %43 = vector.shape_cast %42 : vector<1xf32> to vector<1x1x1xf32>
      %44 = vector.extract %43[0, 0, 0] : f32 from vector<1x1x1xf32>
      %cst_25 = arith.constant 1.24007944E-4 : f32
      %45 = arith.mulf %cst_25, %44 : f32
      %cst_26 = arith.constant 1.22549027E-4 : f32
      %46 = arith.mulf %cst_26, %39 : f32
      %47 = arith.addf %45, %46 : f32
      %c0_27 = arith.constant 0 : index
      %48 = memref.load %arg2[%c0_27] : memref<1xf32, #tpu.memory_space<smem>>
      memref.store %47, %arg2[%c0_27] : memref<1xf32, #tpu.memory_space<smem>>
    } else {
    }
    return
  }
  func.func @transform_0(%arg0: i32) -> (i32, i32) {
    %c0_i32 = arith.constant 0 : i32
    %c0_i32_0 = arith.constant 0 : i32
    return %arg0, %c0_i32 : i32, i32
  }
  func.func @transform_1(%arg0: i32) -> i32 {
    %c0_i32 = arith.constant 0 : i32
    %c0_i32_0 = arith.constant 0 : i32
    return %c0_i32 : i32
  }
}

</mosaic_0001>

<bundles_post_ra>
// kernel: tpu_custom_call.1
= control target key start
LH: loop header
LB: loop body
LE: loop exit
PB: predicated region body
PF: predicated region fallthrough
CT: control target
= control target key end

     0   :  { %6 = vsyncpa [#allocation6], 0  ;;  %s654_s0 = inlined_call_operand.hbm [shape: f32[64,256], index: 0, kind: input, shape index: {}]   ;;  %s655_s1 = inlined_call_operand.hbm [shape: f32[1], index: 1, kind: output, shape index: {}]  }
   0x1   :  { %7 = vsyncpa [#allocation7], 0  ;;  %s12_s8 = sshll.u32 %s654_s0, 4  ;;  %s423_s9 = smov [#allocation5]   ;;  %s13_s8 = int_to_ptr.hbm [resolvable:$true] %s12_s8 }
   0x2   :  { %s14_s10 = sshll.u32 %s423_s9, 4  ;;  %s424_s11 = smov 256   ;;  %s15_s10 = int_to_ptr.vmem [resolvable:$true] %s14_s10 }
   0x3   :  { %s425_s12 = smov 16  }
   0x4   :  { %20 = dma.hbm_to_vmem [thread:$0]  %s13_s8, 2048, %s15_s10, [#allocation6], %s424_s11, %s424_s11, %s425_s12  }
   0x5   :  { %419 = dma.done.wait [#allocation6], 2048  }
   0x6   :  { %420 = vsyncadd [#allocation6], 4294965248  ;;  %v29_v0 = vlaneseq  ;;  %v445_v2 = vld [vmem:[#allocation5 + $0x8] sm:$0xff]  ;;  %v447_v3 = vld [vmem:[#allocation5] sm:$0xff]  ;;  %s426_s0 = smov 127   ;;  %vm273_vm3 = vcmask 1040384  }
   0x7   :  { %v449_v4 = vld [vmem:[#allocation5 + $0x18] sm:$0xff]  ;;  %102 = vrot.lane.b32.xlu1 %v445_v2, %s426_s0  ;;  %v52_v5 = vrot.slane %v445_v2, 1  ;;  %86 = vrot.lane.b32.xlu0 %v447_v3, %s426_s0  ;;  %v51_v6 = vrot.slane %v447_v3, 1  ;;  %v459_v8 = vld [vmem:[#allocation5 + $0x10] sm:$0xff]  ;;  %v467_v13 = vld [vmem:[#allocation5 + $0x20] sm:$0xff]  ;;  %s362_s16 = sshll.u32 %s655_s1, 4  ;;  %s363_s16 = int_to_ptr.hbm [resolvable:$true] %s362_s16 }
   0x8   :  { %v443_v1 = vshrl.u32 %v29_v0, 7  ;;  %v54_v7 = vrot.slane %v449_v4, 1  ;;  %v461_v9 = vld [vmem:[#allocation5 + $0x30] sm:$0xff]  ;;  %v53_v10 = vrot.slane %v459_v8, 1  ;;  %v464_v11 = vld [vmem:[#allocation5 + $0x38] sm:$0xff]  ;;  %v469_v14 = vld [vmem:[#allocation5 + $0x48] sm:$0xff]  ;;  %90 = vrot.lane.b32.xlu2 %v467_v13, %s426_s0 }
   0x9   :  { %v57_v12 = vrot.slane %v461_v9, 1  ;;  %v58_v16 = vrot.slane %v464_v11, 1  ;;  %v55_v17 = vrot.slane %v467_v13, 1  ;;  %v60_v18 = vrot.slane %v469_v14, 1  ;;  %v478_v19 = vld [vmem:[#allocation5 + $0x28] sm:$0xff]  ;;  %v491_v26 = vld [vmem:[#allocation5 + $0x50] sm:$0xff] }
   0xa   :  { %vm69_vm0 = vcmp.lt.s32.totalorder %v443_v1, 7  ;;  %v56_v22 = vrot.slane %v478_v19, 1  ;;  %v61_v30 = vrot.slane %v491_v26, 1  ;;  %v498_v31 = vld [vmem:[#allocation5 + $0x60] sm:$0xff]  ;;  %v504_v35 = vld [vmem:[#allocation5 + $0x68] sm:$0xff]  ;;  %v510_v41 = vld [vmem:[#allocation5 + $0x78] sm:$0xff] }
   0xb   :  { %v83_v15 = vsel %vm69_vm0, %v52_v5, %v54_v7  ;;  %v82_v21 = vsel %vm69_vm0, %v51_v6, %v53_v10  ;;  %v78_v24 = vsel %vm69_vm0, %v55_v17, %v57_v12  ;;  %v80_v25 = vsel %vm69_vm0, %v53_v10, %v55_v17  ;;  %v520_v46 = vld [vmem:[#allocation5 + $0x40] sm:$0xff]  ;;  %v523_v50 = vld [vmem:[#allocation5 + $0x58] sm:$0xff]  ;;  %s428_s21 = smov [#allocation8]  }
   0xc   :  { %v138_v20 = vsub.f32 %v83_v15, %v445_v2  ;;  %v137_v23 = vsub.f32 %v82_v21, %v447_v3  ;;  %v77_v27 = vsel %vm69_vm0, %v58_v16, %v60_v18  ;;  %v139_v28 = vsub.f32 %v80_v25, %v459_v8 }
   0xd   :  { %v141_v29 = vsub.f32 %v78_v24, %v467_v13  ;;  %v79_v33 = vsel %vm69_vm0, %v56_v22, %v58_v16  ;;  %v81_v34 = vsel %vm69_vm0, %v54_v7, %v56_v22  ;;  %v63_v36 = vrot.slane %v498_v31, 1  ;;  %v551_v22 = vld [vmem:[#allocation5 + $0x70] sm:$0xff] }
   0xe   :  { %v153_v32 = vand.u32 2147483647, %v137_v23  ;;  %v155_v37 = vand.u32 2147483647, %v139_v28  ;;  %v144_v38 = vsub.f32 %v77_v27, %v464_v11  ;;  %v142_v39 = vsub.f32 %v79_v33, %v478_v19 }
   0xf   :  { %v64_v40 = vrot.slane %v504_v35, 1  ;;  %104 = vrot.lane.b32.xlu1 %v449_v4, %s426_s0  ;;  %v154_v42 = vand.u32 2147483647, %v138_v20  ;;  %88 = vrot.lane.b32.xlu0 %v459_v8, %s426_s0  ;;  %v140_v43 = vsub.f32 %v81_v34, %v449_v4  ;;  %v72_v44 = vsel %vm69_vm0, %v61_v30, %v63_v36 }
  0x10   :  { %v66_v45 = vrot.slane %v510_v41, 1  ;;  %v157_v47 = vand.u32 2147483647, %v141_v29  ;;  %v201_v48 = vadd.f32 %v155_v37, %v153_v32  ;;  %v59_v49 = vrot.slane %v520_v46, 1  ;;  %106 = vrot.lane.b32.xlu2 %v478_v19, %s426_s0 }
  0x11   :  { %v158_v51 = vand.u32 2147483647, %v142_v39  ;;  %v156_v52 = vand.u32 2147483647, %v140_v43  ;;  %v62_v54 = vrot.slane %v523_v50, 1  ;;  %v147_v56 = vsub.f32 %v72_v44, %v491_v26 }
  0x12   :  { %v71_v53 = vsel %vm69_vm0, %v64_v40, %v66_v45  ;;  %v160_v55 = vand.u32 2147483647, %v144_v38  ;;  %v85_v57 = vsel %vm69_vm0, %v66_v45, %v52_v5  ;;  %v74_v59 = vsel %vm69_vm0, %v59_v49, %v61_v30 }
  0x13   :  { %v214_v58 = vadd.f32 %v156_v52, %v154_v42  ;;  %v76_v60 = vsel %vm69_vm0, %v57_v12, %v59_v49  ;;  %v73_v61 = vsel %vm69_vm0, %v62_v54, %v64_v40  ;;  %v202_v62 = vadd.f32 %v201_v48, %v157_v47 }
  0x14   :  { %v150_v63 = vsub.f32 %v71_v53, %v504_v35  ;;  %v143_v7 = vsub.f32 %v76_v60, %v461_v9  ;;  %v145_v10 = vsub.f32 %v74_v59, %v520_v46  ;;  %v75_v5 = vsel %vm69_vm0, %v60_v18, %v62_v54 }
  0x15   :  { %v215_v15 = vadd.f32 %v214_v58, %v158_v51  ;;  %v148_v16 = vsub.f32 %v73_v61, %v523_v50  ;;  %vm546_vm1 = vcmp.lt.s32.totalorder %v29_v0, 256  ;;  %v146_v21 = vsub.f32 %v75_v5, %v469_v14 }
  0x16   :  { %v159_v12 = vand.u32 2147483647, %v143_v7  ;;  %v161_v20 = vand.u32 2147483647, %v145_v10  ;;  %v163_v23 = vand.u32 2147483647, %v147_v56  ;;  %v152_v24 = vsub.f32 %v85_v57, %v510_v41 }
  0x17   :  { %108 = vrot.lane.b32.xlu1 %v464_v11, %s426_s0  ;;  %92 = vrot.lane.b32.xlu0 %v461_v9, %s426_s0  ;;  %v216_v18 = vadd.f32 %v215_v15, %v160_v55  ;;  %v65_v25 = vrot.slane %v551_v22, 1  ;;  %v427_v27 = vmov 0.0   ;;  %v162_v29 = vand.u32 2147483647, %v146_v21 }
  0x18   :  { %33 = vst.msk [vmem:[#allocation2] sm:$0x3] %vm546_vm1, %v427_v27  ;;  %v203_v28 = vadd.f32 %v202_v62, %v159_v12  ;;  %v164_v30 = vand.u32 2147483647, %v148_v16  ;;  %v166_v32 = vand.u32 2147483647, %v150_v63  ;;  %94 = vrot.lane.b32.xlu2 %v520_v46, %s426_s0 }
  0x19   :  { %34 = vst.msk [vmem:[#allocation3] sm:$0x3] %vm546_vm1, %v427_v27  ;;  %v70_v33 = vsel %vm69_vm0, %v63_v36, %v65_v25  ;;  %v84_v34 = vsel %vm69_vm0, %v65_v25, %v51_v6  ;;  %v217_v38 = vadd.f32 %v216_v18, %v162_v29  ;;  %v168_v42 = vand.u32 2147483647, %v152_v24 }
  0x1a   :  { %v204_v37 = vadd.f32 %v203_v28, %v161_v20  ;;  %v149_v39 = vsub.f32 %v70_v33, %v498_v31  ;;  %v151_v40 = vsub.f32 %v84_v34, %v551_v22 }
  0x1b   :  { %v218_v44 = vadd.f32 %v217_v38, %v164_v30 }
  0x1c   :  { %v205_v43 = vadd.f32 %v204_v37, %v163_v23  ;;  %v165_v45 = vand.u32 2147483647, %v149_v39  ;;  %v167_v47 = vand.u32 2147483647, %v151_v40  ;;  %v592_v23 = vand.u32 127, %v29_v0 }
  0x1d   :  { %v219_v48 = vadd.f32 %v218_v44, %v166_v32 }
  0x1e   :  { %v206_v49 = vadd.f32 %v205_v43, %v165_v45  ;;  %vm120_vm2 = vcmp.lt.s32.totalorder %v592_v23, 127 }
  0x1f   :  { %96 = vrot.lane.b32.xlu1 %v491_v26, %s426_s0  ;;  %110 = vrot.lane.b32.xlu0 %v469_v14, %s426_s0  ;;  %v220_v1 = vadd.f32 %v219_v48, %v168_v42  ;;  %v255_v7 = vld [vmem:[#allocation2] sm:$0x3] }
  0x20   :  { %v207_v6 = vadd.f32 %v206_v49, %v167_v47  ;;  %112 = vrot.lane.b32.xlu2 %v523_v50, %s426_s0 }
  0x21   :  { %v221_v36 = vrot.slane %v220_v1, 4 }
  0x22   :  { %v208_v51 = vrot.slane %v207_v6, 4 }
  0x23   :  { %v222_v52 = vadd.f32 %v221_v36, %v220_v1 }
  0x24   :  { %v209_v53 = vadd.f32 %v208_v51, %v207_v6 }
  0x25   :  { %v223_v54 = vrot.slane %v222_v52, 2 }
  0x26   :  { %v210_v55 = vrot.slane %v209_v53, 2 }
  0x27   :  { %114 = vrot.lane.b32.xlu1 %v504_v35, %s426_s0  ;;  %98 = vrot.lane.b32.xlu0 %v498_v31, %s426_s0  ;;  %v224_v56 = vadd.f32 %v223_v54, %v222_v52 }
  0x28   :  { %v211_v57 = vadd.f32 %v210_v55, %v209_v53  ;;  %100 = vrot.lane.b32.xlu2 %v551_v22, %s426_s0 }
  0x29   :  { %v225_v58 = vrot.slane %v224_v56, 1 }
  0x2a   :  { %v212_v59 = vrot.slane %v211_v57, 1 }
  0x2b   :  { %v226_v60 = vadd.f32 %v225_v58, %v224_v56 }
  0x2c   :  { %v213_v61 = vadd.f32 %v212_v59, %v211_v57 }
  0x2d   :  { %v228_v62 = vsub.f32 %v226_v60, %v168_v42 }
  0x2e   :  { %v227_v63 = vsub.f32 %v213_v61, %v167_v47 }
  0x2f   :  { %116 = vrot.lane.b32.xlu0 %v510_v41, %s426_s0  ;;  %259 = vst [vmem:[#allocation1 + $0x9] sm:$0xff] %v228_v62 }
  0x30   :  { %258 = vst [vmem:[#allocation1] sm:$0xff] %v227_v63 }
  0x37   :  { %v261_v10 = vld [vmem:[#allocation1 + $0x7] ss:$9 sm:$0xff] }
  0x38   :  { %v263_v15 = vadd.f32 %v261_v10, %v255_v7  ;;  %302 = vst [vmem:[#allocation1] sm:$0xff] %v551_v22 }
  0x39   :  { %303 = vst [vmem:[#allocation1 + $0x9] sm:$0xff] %v510_v41 }
  0x3a   :  { %268 = vst.msk [vmem:[#allocation2] sm:$0x3] %vm546_vm1, %v263_v15 }
  0x41   :  { %v334_v63 = vld [vmem:[#allocation2] sm:$0x3] }
  0x42   :  { %v336_v15 = vperm.slane %v334_v63, 0 }
  0x62   :  { %v91_v5 = vpop.permute.xlu2 %90 }
  0x6a   :  { %v107_v18 = vpop.permute.xlu2 %106 }
  0x6b   :  { %v123_v38 = vsel %vm120_vm2, %v91_v5, %v107_v18  ;;  %v131_v39 = vsel %vm120_vm2, %v107_v18, %v91_v5  ;;  %v337_v5 = vperm.slane %v334_v63, 1 }
  0x72   :  { %v95_v29 = vpop.permute.xlu2 %94 }
  0x79   :  { %v103_v16 = vpop.permute.xlu1 %102  ;;  %v87_v12 = vpop.permute.xlu0 %86 }
  0x7a   :  { %v121_v30 = vsel %vm120_vm2, %v87_v12, %v103_v16  ;;  %v129_v32 = vsel %vm120_vm2, %v103_v16, %v87_v12  ;;  %v113_v36 = vpop.permute.xlu2 %112 }
  0x7b   :  { %v169_v34 = vsub.f32 %v121_v30, %v447_v3  ;;  %v170_v37 = vsub.f32 %v129_v32, %v445_v2  ;;  %v173_v3 = vsub.f32 %v123_v38, %v467_v13  ;;  %v174_v2 = vsub.f32 %v131_v39, %v478_v19 }
  0x7d   :  { %v185_v45 = vand.u32 2147483647, %v169_v34  ;;  %v186_v47 = vand.u32 2147483647, %v170_v37  ;;  %v189_v53 = vand.u32 2147483647, %v173_v3 }
  0x7e   :  { %v190_v54 = vand.u32 2147483647, %v174_v2 }
  0x81   :  { %v105_v20 = vpop.permute.xlu1 %104  ;;  %v89_v21 = vpop.permute.xlu0 %88 }
  0x82   :  { %v122_v27 = vsel %vm120_vm2, %v89_v21, %v105_v20  ;;  %v130_v28 = vsel %vm120_vm2, %v105_v20, %v89_v21  ;;  %v341_v21 = vsel %vm273_vm3, %v337_v5, 0.0 }
  0x83   :  { %v171_v0 = vsub.f32 %v122_v27, %v459_v8  ;;  %v172_v33 = vsub.f32 %v130_v28, %v449_v4 }
  0x85   :  { %v187_v40 = vand.u32 2147483647, %v171_v0  ;;  %v188_v42 = vand.u32 2147483647, %v172_v33 }
  0x87   :  { %v229_v51 = vadd.f32 %v187_v40, %v185_v45  ;;  %v242_v52 = vadd.f32 %v188_v42, %v186_v47 }
  0x89   :  { %v109_v24 = vpop.permute.xlu1 %108  ;;  %v93_v25 = vpop.permute.xlu0 %92  ;;  %v230_v57 = vadd.f32 %v229_v51, %v189_v53  ;;  %v243_v58 = vadd.f32 %v242_v52, %v190_v54 }
  0x8a   :  { %v124_v43 = vsel %vm120_vm2, %v93_v25, %v109_v24  ;;  %v132_v8 = vsel %vm120_vm2, %v109_v24, %v93_v25 }
  0x8b   :  { %v175_v48 = vsub.f32 %v124_v43, %v461_v9  ;;  %v176_v49 = vsub.f32 %v132_v8, %v464_v11 }
  0x8d   :  { %v191_v55 = vand.u32 2147483647, %v175_v48  ;;  %v192_v56 = vand.u32 2147483647, %v176_v49 }
  0x8f   :  { %v231_v16 = vadd.f32 %v230_v57, %v191_v55  ;;  %v244_v12 = vadd.f32 %v243_v58, %v192_v56 }
  0x91   :  { %v97_v44 = vpop.permute.xlu1 %96  ;;  %v111_v4 = vpop.permute.xlu0 %110 }
  0x92   :  { %v125_v1 = vsel %vm120_vm2, %v95_v29, %v111_v4  ;;  %v133_v6 = vsel %vm120_vm2, %v111_v4, %v95_v29  ;;  %v126_v9 = vsel %vm120_vm2, %v97_v44, %v113_v36  ;;  %v134_v11 = vsel %vm120_vm2, %v113_v36, %v97_v44  ;;  %v101_v29 = vpop.permute.xlu2 %100 }
  0x93   :  { %v177_v13 = vsub.f32 %v125_v1, %v520_v46  ;;  %v178_v19 = vsub.f32 %v133_v6, %v469_v14  ;;  %v179_v61 = vsub.f32 %v126_v9, %v491_v26  ;;  %v180_v62 = vsub.f32 %v134_v11, %v523_v50 }
  0x94   :  { %v340_v50 = vsel %vm273_vm3, %v336_v15, 0.0 }
  0x95   :  { %v193_v7 = vand.u32 2147483647, %v177_v13  ;;  %v194_v10 = vand.u32 2147483647, %v178_v19  ;;  %v342_v18 = vadd.f32 %v341_v21, %v340_v50  ;;  %v195_v27 = vand.u32 2147483647, %v179_v61 }
  0x96   :  { %v196_v28 = vand.u32 2147483647, %v180_v62  ;;  %v311_v13 = vadd.s32 128, %v592_v23 }
  0x97   :  { %v232_v24 = vadd.f32 %v231_v16, %v193_v7  ;;  %v245_v25 = vadd.f32 %v244_v12, %v194_v10  ;;  %343 = vadd.xlane.f32.xlu2 %v342_v18 }
  0x98   :  { %vm313_vm4 = vcmp.lt.s32.totalorder %v311_v13, 255 }
  0x99   :  { %v115_v59 = vpop.permute.xlu1 %114  ;;  %v99_v60 = vpop.permute.xlu0 %98  ;;  %v246_v34 = vadd.f32 %v245_v25, %v196_v28 }
  0x9a   :  { %v127_v46 = vsel %vm120_vm2, %v99_v60, %v115_v59  ;;  %v135_v14 = vsel %vm120_vm2, %v115_v59, %v99_v60 }
  0x9b   :  { %v181_v20 = vsub.f32 %v127_v46, %v498_v31  ;;  %v182_v26 = vsub.f32 %v135_v14, %v504_v35  ;;  %v233_v35 = vadd.f32 %v232_v24, %v195_v27 }
  0x9d   :  { %v197_v30 = vand.u32 2147483647, %v181_v20  ;;  %v198_v32 = vand.u32 2147483647, %v182_v26 }
  0x9f   :  { %v234_v39 = vadd.f32 %v233_v35, %v197_v30  ;;  %v247_v40 = vadd.f32 %v246_v34, %v198_v32 }
  0xa1   :  { %v117_v0 = vpop.permute.xlu0 %116 }
  0xa2   :  { %v128_v33 = vsel %vm120_vm2, %v101_v29, %v117_v0  ;;  %v136_v31 = vsel %vm120_vm2, %v117_v0, %v101_v29 }
  0xa3   :  { %v183_v37 = vsub.f32 %v128_v33, %v551_v22  ;;  %v184_v38 = vsub.f32 %v136_v31, %v510_v41  ;;  %v269_v41 = vld [vmem:[#allocation3] sm:$0x3] }
  0xa5   :  { %v199_v42 = vand.u32 2147483647, %v183_v37  ;;  %v200_v43 = vand.u32 2147483647, %v184_v38 }
  0xa7   :  { %v235_v8 = vadd.f32 %v234_v39, %v199_v42  ;;  %v248_v44 = vadd.f32 %v247_v40, %v200_v43 }
  0xa9   :  { %v236_v4 = vrot.slane %v235_v8, 4  ;;  %v249_v3 = vrot.slane %v248_v44, 4 }
  0xab   :  { %v237_v2 = vadd.f32 %v236_v4, %v235_v8  ;;  %v250_v45 = vadd.f32 %v249_v3, %v248_v44 }
  0xad   :  { %v238_v47 = vrot.slane %v237_v2, 2  ;;  %v251_v48 = vrot.slane %v250_v45, 2 }
  0xaf   :  { %v239_v49 = vadd.f32 %v238_v47, %v237_v2  ;;  %v252_v1 = vadd.f32 %v251_v48, %v250_v45 }
  0xb1   :  { %v240_v6 = vrot.slane %v239_v49, 1  ;;  %v253_v36 = vrot.slane %v252_v1, 1 }
  0xb3   :  { %v254_v51 = vadd.f32 %v253_v36, %v252_v1  ;;  %v241_v22 = vadd.f32 %v240_v6, %v239_v49 }
  0xb5   :  { %v272_v52 = vrot.slane %v254_v51, 7 }
  0xb7   :  { %v274_v53 = vsel %vm273_vm3, %v241_v22, %v272_v52 }
  0xb8   :  { %v276_v54 = vadd.f32 %v274_v53, %v269_v41 }
  0xba   :  { %277 = vst.msk [vmem:[#allocation3] sm:$0x3] %vm546_vm1, %v276_v54 }
  0xc1   :  { %v314_v19 = vld [vmem:[#allocation3] sm:$0x3] }
  0xc2   :  { %v316_v9 = vperm.slane %v314_v19, 0  ;;  %v317_v11 = vperm.slane %v314_v19, 1 }
  0xc4   :  { %v321_v55 = vsel %vm313_vm4, %v317_v11, 0.0  ;;  %v322_v56 = vsel %vm273_vm3, %v316_v9, 0.0 }
  0xc5   :  { %v323_v57 = vsel %vm273_vm3, %v321_v55, 0.0 }
  0xc6   :  { %v324_v58 = vadd.f32 %v323_v57, %v322_v56 }
  0xc8   :  { %325 = vadd.xlane.f32.xlu1 %v324_v58 }
 0x10a   :  { %v344_v59 = vpop.xlane.xlu2 %343 }
 0x10b   :  { %v345_v60 = vrot.slane %v344_v59, 4 }
 0x10d   :  { %v346_v61 = vadd.f32 %v345_v60, %v344_v59 }
 0x10f   :  { %v347_v62 = vrot.slane %v346_v61, 2 }
 0x111   :  { %v348_v63 = vadd.f32 %v347_v62, %v346_v61 }
 0x113   :  { %v349_v10 = vrot.slane %v348_v63, 1 }
 0x115   :  { %v350_v16 = vadd.f32 %v349_v10, %v348_v63 }
 0x13b   :  { %v326_v46 = vpop.xlane.xlu1 %325 }
 0x13c   :  { %v327_v17 = vrot.slane %v326_v46, 4 }
 0x13e   :  { %v328_v14 = vadd.f32 %v327_v17, %v326_v46 }
 0x140   :  { %v329_v23 = vrot.slane %v328_v14, 2 }
 0x142   :  { %v330_v7 = vadd.f32 %v329_v23, %v328_v14 }
 0x144   :  { %v331_v15 = vrot.slane %v330_v7, 1 }
 0x146   :  { %v332_v5 = vadd.f32 %v331_v15, %v330_v7 }
 0x148   :  { %373 = vpush %v332_v5 }
 0x149   :  { %375 = vpush %v350_v16 }
 0x179   :  { %s374_s13 = spop %373 }
 0x17a   :  { %s353_s17 = smul.f32 0.00012254903, %s374_s13  ;;  %s376_s18 = spop %375 }
 0x17b   :  { %s352_s19 = smul.f32 0.00012400794, %s376_s18 }
 0x17d   :  { %s354_s20 = sadd.f32 %s353_s17, %s352_s19 }
 0x17f   :  { %356 = sst [smem:[#allocation8]] %s354_s20 }
 0x180   :  { %365 = dma.smem_to_hbm %s428_s21, 16, %s363_s16, [#allocation7]  }
 0x181   :  { %421 = dma.done.wait [#allocation7], 16  }
 0x182   :  { %422 = vsyncadd [#allocation7], 4294967280 }
 0x183   :  { %370 = sfence }
 0x184   :  { %371 = vsyncpa [#allocation6], 1 }
 0x185   :  { %372 = vsyncpa [#allocation7], 1 }

</bundles_post_ra>
